<compile_context>
chip_gen: v6e
topology: v6e:2x2x1
jax: 0.10.0
libtpu: 0.0.40
codegen_flags: <defaults>
</compile_context>

<pallas_src>
import jax
import jax.numpy as jnp
import numpy as np
from jax.experimental import pallas as pl
from jax.experimental.pallas import tpu as pltpu

EPS = 1e-3  # BatchNorm2d eps from the module


# ----------------------------------------------------------------------------
# Device-dependent knobs (safe fallbacks if detection fails).
# ----------------------------------------------------------------------------
def _device_kind() -> str:
    try:
        return jax.devices()[0].device_kind.lower()
    except Exception:
        return ""


def _num_cout_blocks(cout: int) -> int:
    """Split Cout across the 2 TensorCores only on v7x; 1 block elsewhere."""
    kind = _device_kind()
    n = 2 if "v7" in kind else 1
    # Keep sublane alignment (block second-to-last dim divisible by 8).
    while n > 1 and (cout % n != 0 or (cout // n) % 8 != 0):
        n -= 1
    return max(n, 1)


def _use_bf16_matmul() -> bool:
    """bf16 matmul inputs only on v5e (f32 matmul is multi-pass on its MXU)."""
    kind = _device_kind()
    return ("v5e" in kind) or ("v5 lite" in kind) or ("v5lite" in kind)


# ----------------------------------------------------------------------------
# Kernel
# ----------------------------------------------------------------------------
def conv_bn_add_kernel(x_ref, w_ref, res_ref, gb_ref, o_ref):
    # x_ref:   (Cin, M)        channels-first activation rows (f32 or bf16)
    # w_ref:   (Cout_blk, Cin) conv weights for this output-channel block
    # res_ref: (Cout_blk, M)   residual (f32)
    # gb_ref:  (Cout_blk, 2)   packed [gamma, beta] (f32)
    # o_ref:   (Cout_blk, M)   output (f32), aliased with res_ref's HBM buffer
    #
    # 1x1 conv == matmul on the MXU, f32 accumulation.
    y = jnp.dot(w_ref[...], x_ref[...],
                preferred_element_type=jnp.float32)            # (Cout_blk, M)

    # Training-mode BatchNorm batch stats over all M = N*H*W positions,
    # biased variance, two-pass (centered) for numerical robustness.
    m = y.shape[1]
    inv_m = 1.0 / m
    mean = jnp.sum(y, axis=-1, keepdims=True) * inv_m          # (Cout_blk, 1)
    yc = y - mean
    var = jnp.sum(yc * yc, axis=-1, keepdims=True) * inv_m     # (Cout_blk, 1)
    inv_std = jax.lax.rsqrt(var + EPS)

    gamma = gb_ref[:, 0:1]                                     # (Cout_blk, 1)
    beta = gb_ref[:, 1:2]                                      # (Cout_blk, 1)
    scale = inv_std * gamma

    # out = res + (y - mean) * scale + beta   (one fused FMA-style epilogue)
    o_ref[...] = res_ref[...] + yc * scale + beta


# ----------------------------------------------------------------------------
# Wrapper
# ----------------------------------------------------------------------------
def conv_bn_add(x_nchw, w_oihw, gamma, beta, res_nchw,
                num_cout_blocks=None, matmul_dtype=None):
    N, Cin, H, W = x_nchw.shape
    Cout = w_oihw.shape[0]
    M = N * H * W

    if num_cout_blocks is None:
        num_cout_blocks = _num_cout_blocks(Cout)
    if matmul_dtype is None:
        matmul_dtype = jnp.bfloat16 if _use_bf16_matmul() else jnp.float32
    cout_blk = Cout // num_cout_blocks

    # Channels-first flattening.  For N == 1 (the module's case) these are
    # pure reshapes — no standalone XLA transposes around the fused call.
    if N == 1:
        x2 = x_nchw.reshape(Cin, M)
        r2 = res_nchw.reshape(Cout, M)
    else:
        x2 = jnp.transpose(x_nchw, (1, 0, 2, 3)).reshape(Cin, M)
        r2 = jnp.transpose(res_nchw, (1, 0, 2, 3)).reshape(Cout, M)

    wm = w_oihw.reshape(Cout, Cin)                       # no transpose needed
    x2 = x2.astype(matmul_dtype)
    wm = wm.astype(matmul_dtype)
    r2 = r2.astype(jnp.float32)
    gb = jnp.stack([gamma, beta], axis=1).astype(jnp.float32)   # (Cout, 2)

    itm = jnp.dtype(matmul_dtype).itemsize
    cost = pl.CostEstimate(
        flops=2 * Cout * Cin * M + 6 * Cout * M,
        transcendentals=Cout,                                    # rsqrt
        bytes_accessed=(Cin * M * itm + Cout * Cin * itm
                        + 2 * Cout * M * 4 + Cout * 2 * 4),
    )

    out = pl.pallas_call(
        conv_bn_add_kernel,
        out_shape=jax.ShapeDtypeStruct((Cout, M), jnp.float32),
        grid=(num_cout_blocks,),
        in_specs=[
            pl.BlockSpec((Cin, M), lambda i: (0, 0)),        # x: shared
            pl.BlockSpec((cout_blk, Cin), lambda i: (i, 0)), # W: split on Cout
            pl.BlockSpec((cout_blk, M), lambda i: (i, 0)),   # residual
            pl.BlockSpec((cout_blk, 2), lambda i: (i, 0)),   # packed gamma/beta
        ],
        out_specs=pl.BlockSpec((cout_blk, M), lambda i: (i, 0)),
        input_output_aliases={2: 0},                         # res buffer -> out
        cost_estimate=cost,
        compiler_params=pltpu.CompilerParams(
            dimension_semantics=("parallel",)),
    )(x2, wm, r2, gb)

    # Back to NCHW: a pure reshape when N == 1.
    if N == 1:
        return out.reshape(N, Cout, H, W)
    return out.reshape(Cout, N, H, W).transpose(1, 0, 2, 3)


# ----------------------------------------------------------------------------
# Pure-JAX reference (same semantics: conv1x1 + training-mode BN with biased
# batch variance + residual add), kept in NCHW.
# TODO(synk): running_mean/running_var momentum updates of BatchNorm2d are not
# reproduced (only the forward output is).
# ----------------------------------------------------------------------------
def reference(x_nchw, w_oihw, gamma, beta, res_nchw):
    Cout = w_oihw.shape[0]
    y = jax.lax.conv_general_dilated(
        x_nchw, w_oihw, window_strides=(1, 1), padding="VALID",
        dimension_numbers=("NCHW", "OIHW", "NCHW"))
    mean = jnp.mean(y, axis=(0, 2, 3), keepdims=True)
    var = jnp.mean((y - mean) ** 2, axis=(0, 2, 3), keepdims=True)
    y_n = ((y - mean) / jnp.sqrt(var + EPS)
           * gamma.reshape(1, Cout, 1, 1) + beta.reshape(1, Cout, 1, 1))
    return res_nchw + y_n


if __name__ == "__main__":
    key = jax.random.PRNGKey(0)
    k1, k2, k3, k4, k5 = jax.random.split(key, 5)

    # Shapes from the module (already small).
    N, Cin, Cout, H, W = 1, 480, 112, 14, 14

    x119 = jax.random.normal(k1, (N, Cin, H, W), dtype=jnp.float32)
    x135 = jax.random.normal(k2, (N, Cout, H, W), dtype=jnp.float32)

    # Deterministic synthetic parameters (not a checkpoint load).
    conv_w = jax.random.normal(k3, (Cout, Cin, 1, 1), dtype=jnp.float32) * 0.05
    bn_gamma = 1.0 + 0.1 * jax.random.normal(k4, (Cout,), dtype=jnp.float32)
    bn_beta = 0.1 * jax.random.normal(k5, (Cout,), dtype=jnp.float32)

    out = conv_bn_add(x119, conv_w, bn_gamma, bn_beta, x135)
    out = jax.block_until_ready(out)

    ref = jax.block_until_ready(reference(x119, conv_w, bn_gamma, bn_beta, x135))
    assert out.shape == (N, Cout, H, W)

    # Loosen tolerance only when the v5e bf16-matmul path is active.
    tol = 3e-2 if _use_bf16_matmul() else 2e-4
    np.testing.assert_allclose(np.asarray(out), np.asarray(ref),
                               rtol=tol, atol=tol)

    print("KERNEL_OK")
</pallas_src>

<mosaic_0001>
module attributes {stable_mosaic.version = 11 : i64} {
  func.func @conv_bn_add_kernel(%arg0: i32, %arg1: memref<480x196xf32, #tpu.memory_space<vmem>>, %arg2: memref<112x480xf32, #tpu.memory_space<vmem>>, %arg3: memref<112x196xf32, #tpu.memory_space<vmem>>, %arg4: memref<112x2xf32, #tpu.memory_space<vmem>>, %arg5: memref<112x196xf32, #tpu.memory_space<vmem>>) attributes {dimension_semantics = [#tpu.dimension_semantics<parallel>], iteration_bounds = array<i64: 1>, scalar_prefetch = 0 : i64, scratch_operands = 0 : i64, tpu.core_type = #tpu.core_type<tc>, window_params = [{pipeline_mode = #tpu.pipeline_mode<synchronous>, transform_indices = @transform_0, window_bounds = array<i64: 480, 196>}, {transform_indices = @transform_1, window_bounds = array<i64: 112, 480>}, {transform_indices = @transform_2, window_bounds = array<i64: 112, 196>}, {transform_indices = @transform_3, window_bounds = array<i64: 112, 2>}, {transform_indices = @transform_4, window_bounds = array<i64: 112, 196>}]} {
    %c0 = arith.constant 0 : index
    %c0_0 = arith.constant 0 : index
    %0 = vector.load %arg2[%c0, %c0_0] : memref<112x480xf32, #tpu.memory_space<vmem>>, vector<112x480xf32>
    %c0_1 = arith.constant 0 : index
    %c0_2 = arith.constant 0 : index
    %1 = vector.load %arg1[%c0_1, %c0_2] : memref<480x196xf32, #tpu.memory_space<vmem>>, vector<480x196xf32>
    %cst = arith.constant dense<0.000000e+00> : vector<112x196xf32>
    %2 = tpu.matmul %0, %1, %cst {dimension_numbers = #tpu.dot_dimension_numbers<[1], [0], [0], [1], [0, 0, 1, 1], [], []>} : vector<112x480xf32>, vector<480x196xf32>, vector<112x196xf32> -> vector<112x196xf32>
    %cst_3 = arith.constant dense<0.000000e+00> : vector<112xf32>
    %3 = vector.multi_reduction <add>, %2, %cst_3 [1] : vector<112x196xf32> to vector<112xf32>
    %4 = vector.shape_cast %3 : vector<112xf32> to vector<112x1xf32>
    %cst_4 = arith.constant 0.00510204071 : f32
    %5 = vector.broadcast %cst_4 : f32 to vector<112x1xf32>
    %6 = arith.mulf %4, %5 : vector<112x1xf32>
    %7 = vector.broadcast %6 : vector<112x1xf32> to vector<112x196xf32>
    %8 = arith.subf %2, %7 : vector<112x196xf32>
    %9 = arith.mulf %8, %8 : vector<112x196xf32>
    %cst_5 = arith.constant dense<0.000000e+00> : vector<112xf32>
    %10 = vector.multi_reduction <add>, %9, %cst_5 [1] : vector<112x196xf32> to vector<112xf32>
    %11 = vector.shape_cast %10 : vector<112xf32> to vector<112x1xf32>
    %cst_6 = arith.constant 0.00510204071 : f32
    %12 = vector.broadcast %cst_6 : f32 to vector<112x1xf32>
    %13 = arith.mulf %11, %12 : vector<112x1xf32>
    %cst_7 = arith.constant 1.000000e-03 : f32
    %14 = vector.broadcast %cst_7 : f32 to vector<112x1xf32>
    %15 = arith.addf %13, %14 : vector<112x1xf32>
    %16 = math.rsqrt %15 : vector<112x1xf32>
    %c0_8 = arith.constant 0 : index
    %c0_9 = arith.constant 0 : index
    %17 = vector.load %arg4[%c0_8, %c0_9] : memref<112x2xf32, #tpu.memory_space<vmem>>, vector<112x1xf32>
    %c0_10 = arith.constant 0 : index
    %c1 = arith.constant 1 : index
    %18 = vector.load %arg4[%c0_10, %c1] : memref<112x2xf32, #tpu.memory_space<vmem>>, vector<112x1xf32>
    %19 = arith.mulf %16, %17 : vector<112x1xf32>
    %c0_11 = arith.constant 0 : index
    %c0_12 = arith.constant 0 : index
    %20 = vector.load %arg3[%c0_11, %c0_12] : memref<112x196xf32, #tpu.memory_space<vmem>>, vector<112x196xf32>
    %21 = vector.broadcast %19 : vector<112x1xf32> to vector<112x196xf32>
    %22 = arith.mulf %8, %21 : vector<112x196xf32>
    %23 = arith.addf %20, %22 : vector<112x196xf32>
    %24 = vector.broadcast %18 : vector<112x1xf32> to vector<112x196xf32>
    %25 = arith.addf %23, %24 : vector<112x196xf32>
    %c0_13 = arith.constant 0 : index
    %c0_14 = arith.constant 0 : index
    %26 = vector.load %arg5[%c0_13, %c0_14] : memref<112x196xf32, #tpu.memory_space<vmem>>, vector<112x196xf32>
    tpu.vector_store %arg5[%c0_13, %c0_14], %25 {strides = array<i32>} : memref<112x196xf32, #tpu.memory_space<vmem>>, vector<112x196xf32>,
    return
  }
  func.func @transform_0(%arg0: i32) -> (i32, i32) {
    %c0_i32 = arith.constant 0 : i32
    %c0_i32_0 = arith.constant 0 : i32
    %c0_i32_1 = arith.constant 0 : i32
    return %c0_i32, %c0_i32_0 : i32, i32
  }
  func.func @transform_1(%arg0: i32) -> (i32, i32) {
    %c0_i32 = arith.constant 0 : i32
    %c0_i32_0 = arith.constant 0 : i32
    return %arg0, %c0_i32 : i32, i32
  }
  func.func @transform_2(%arg0: i32) -> (i32, i32) {
    %c0_i32 = arith.constant 0 : i32
    %c0_i32_0 = arith.constant 0 : i32
    return %arg0, %c0_i32 : i32, i32
  }
  func.func @transform_3(%arg0: i32) -> (i32, i32) {
    %c0_i32 = arith.constant 0 : i32
    %c0_i32_0 = arith.constant 0 : i32
    return %arg0, %c0_i32 : i32, i32
  }
  func.func @transform_4(%arg0: i32) -> (i32, i32) {
    %c0_i32 = arith.constant 0 : i32
    %c0_i32_0 = arith.constant 0 : i32
    return %arg0, %c0_i32 : i32, i32
  }
}

</mosaic_0001>

<bundles_post_ra>
// kernel: tpu_custom_call.1
= control target key start
LH: loop header
LB: loop body
LE: loop exit
PB: predicated region body
PF: predicated region fallthrough
CT: control target
= control target key end

     0   :  { %vm193_vm0 = vcmask 785408   ;;  %vm534_vm1 = vcmask 556032   ;;  %s2266_s0 = inlined_call_operand.vmem [shape: f32[480,196], index: 0, kind: input, shape index: {}]   ;;  %s2267_s1 = inlined_call_operand.vmem [shape: f32[112,480], index: 1, kind: input, shape index: {}]   ;;  %s2268_s3 = inlined_call_operand.vmem [shape: f32[112,2], index: 3, kind: input, shape index: {}]   ;;  %s2269_s2 = inlined_call_operand.vmem [shape: f32[112,196], index: 2, kind: input, shape index: {}, may-alias: {2,4}]   ;;  %s2270_s4 = inlined_call_operand.vmem [shape: f32[112,196], index: 4, kind: output, shape index: {}, may-alias: {2,4}]  }
   0x1   :  { %v104_v0 = vld [vmem:[%s2266_s0 + $0xf8] sm:$0xff]  ;;  %v103_v1 = vld [vmem:[%s2266_s0 + $0xf0] sm:$0xff]  ;;  %v102_v2 = vld [vmem:[%s2266_s0 + $0xe8] sm:$0xff] }
   0x2   :  { %236 = vmatprep.subr.mxu0 %v104_v0  ;;  %v101_v3 = vld [vmem:[%s2266_s0 + $0xe0] sm:$0xff]  ;;  %v100_v4 = vld [vmem:[%s2266_s0 + $0xd8] sm:$0xff]  ;;  %v99_v6 = vld [vmem:[%s2266_s0 + $0xd0] sm:$0xff] }
   0x3   :  { %237 = vmatpush1.msra.mxu0 %v103_v1  ;;  %v168_v5 = vld [vmem:[%s2266_s0 + $0x2f8] sm:$0xff]  ;;  %v167_v7 = vld [vmem:[%s2266_s0 + $0x2f0] sm:$0xff]  ;;  %v166_v8 = vld [vmem:[%s2266_s0 + $0x2e8] sm:$0xff] }
   0x4   :  { %238 = vmatprep.subr.mxu0 %v102_v2  ;;  %385 = vmatprep.subr.mxu1 %v168_v5  ;;  %v98_v9 = vld [vmem:[%s2266_s0 + $0xc8] sm:$0xff]  ;;  %v165_v10 = vld [vmem:[%s2266_s0 + $0x2e0] sm:$0xff]  ;;  %v164_v12 = vld [vmem:[%s2266_s0 + $0x2d8] sm:$0xff] }
   0x5   :  { %239 = vmatpush1.msra.mxu0 %v101_v3  ;;  %386 = vmatpush1.msra.mxu1 %v167_v7  ;;  %v97_v11 = vld [vmem:[%s2266_s0 + $0xc0] sm:$0xff]  ;;  %v163_v13 = vld [vmem:[%s2266_s0 + $0x2d0] sm:$0xff]  ;;  %v96_v14 = vld [vmem:[%s2266_s0 + $0xb8] sm:$0xff] }
   0x6   :  { %240 = vmatprep.subr.mxu0 %v100_v4  ;;  %387 = vmatprep.subr.mxu1 %v166_v8  ;;  %v162_v15 = vld [vmem:[%s2266_s0 + $0x2c8] sm:$0xff]  ;;  %v95_v16 = vld [vmem:[%s2266_s0 + $0xb0] sm:$0xff]  ;;  %v161_v17 = vld [vmem:[%s2266_s0 + $0x2c0] sm:$0xff] }
   0x7   :  { %241 = vmatpush1.msra.mxu0 %v99_v6  ;;  %388 = vmatpush1.msra.mxu1 %v165_v10  ;;  %v94_v18 = vld [vmem:[%s2266_s0 + $0xa8] sm:$0xff]  ;;  %v160_v19 = vld [vmem:[%s2266_s0 + $0x2b8] sm:$0xff]  ;;  %v93_v20 = vld [vmem:[%s2266_s0 + $0xa0] sm:$0xff] }
   0x8   :  { %242 = vmatprep.subr.mxu0 %v98_v9  ;;  %389 = vmatprep.subr.mxu1 %v164_v12  ;;  %v159_v21 = vld [vmem:[%s2266_s0 + $0x2b0] sm:$0xff]  ;;  %v92_v22 = vld [vmem:[%s2266_s0 + $0x98] sm:$0xff]  ;;  %v158_v23 = vld [vmem:[%s2266_s0 + $0x2a8] sm:$0xff] }
   0x9   :  { %243 = vmatpush1.msra.mxu0 %v97_v11  ;;  %390 = vmatpush1.msra.mxu1 %v163_v13  ;;  %v91_v24 = vld [vmem:[%s2266_s0 + $0x90] sm:$0xff]  ;;  %v157_v25 = vld [vmem:[%s2266_s0 + $0x2a0] sm:$0xff]  ;;  %v90_v26 = vld [vmem:[%s2266_s0 + $0x88] sm:$0xff] }
   0xa   :  { %244 = vmatprep.subr.mxu0 %v96_v14  ;;  %391 = vmatprep.subr.mxu1 %v162_v15  ;;  %v156_v27 = vld [vmem:[%s2266_s0 + $0x298] sm:$0xff]  ;;  %v89_v28 = vld [vmem:[%s2266_s0 + $0x80] sm:$0xff]  ;;  %v155_v29 = vld [vmem:[%s2266_s0 + $0x290] sm:$0xff] }
   0xb   :  { %245 = vmatpush1.msra.mxu0 %v95_v16  ;;  %392 = vmatpush1.msra.mxu1 %v161_v17  ;;  %v88_v30 = vld [vmem:[%s2266_s0 + $0x78] sm:$0xff]  ;;  %v154_v31 = vld [vmem:[%s2266_s0 + $0x288] sm:$0xff]  ;;  %v87_v32 = vld [vmem:[%s2266_s0 + $0x70] sm:$0xff] }
   0xc   :  { %246 = vmatprep.subr.mxu0 %v94_v18  ;;  %393 = vmatprep.subr.mxu1 %v160_v19  ;;  %v153_v33 = vld [vmem:[%s2266_s0 + $0x280] sm:$0xff]  ;;  %v86_v34 = vld [vmem:[%s2266_s0 + $0x68] sm:$0xff]  ;;  %v152_v35 = vld [vmem:[%s2266_s0 + $0x278] sm:$0xff] }
   0xd   :  { %247 = vmatpush1.msra.mxu0 %v93_v20  ;;  %394 = vmatpush1.msra.mxu1 %v159_v21  ;;  %v85_v36 = vld [vmem:[%s2266_s0 + $0x60] sm:$0xff]  ;;  %v151_v37 = vld [vmem:[%s2266_s0 + $0x270] sm:$0xff]  ;;  %v84_v38 = vld [vmem:[%s2266_s0 + $0x58] sm:$0xff] }
   0xe   :  { %248 = vmatprep.subr.mxu0 %v92_v22  ;;  %395 = vmatprep.subr.mxu1 %v158_v23  ;;  %v150_v39 = vld [vmem:[%s2266_s0 + $0x268] sm:$0xff]  ;;  %v83_v40 = vld [vmem:[%s2266_s0 + $0x50] sm:$0xff]  ;;  %v149_v41 = vld [vmem:[%s2266_s0 + $0x260] sm:$0xff] }
   0xf   :  { %249 = vmatpush1.msra.mxu0 %v91_v24  ;;  %396 = vmatpush1.msra.mxu1 %v157_v25  ;;  %v82_v42 = vld [vmem:[%s2266_s0 + $0x48] sm:$0xff]  ;;  %v148_v43 = vld [vmem:[%s2266_s0 + $0x258] sm:$0xff]  ;;  %v81_v44 = vld [vmem:[%s2266_s0 + $0x40] sm:$0xff] }
  0x10   :  { %250 = vmatprep.subr.mxu0 %v90_v26  ;;  %397 = vmatprep.subr.mxu1 %v156_v27  ;;  %v147_v45 = vld [vmem:[%s2266_s0 + $0x250] sm:$0xff]  ;;  %v80_v46 = vld [vmem:[%s2266_s0 + $0x38] sm:$0xff]  ;;  %v146_v47 = vld [vmem:[%s2266_s0 + $0x248] sm:$0xff] }
  0x11   :  { %251 = vmatpush1.msra.mxu0 %v89_v28  ;;  %398 = vmatpush1.msra.mxu1 %v155_v29  ;;  %v79_v48 = vld [vmem:[%s2266_s0 + $0x30] sm:$0xff]  ;;  %v145_v49 = vld [vmem:[%s2266_s0 + $0x240] sm:$0xff]  ;;  %v78_v50 = vld [vmem:[%s2266_s0 + $0x28] sm:$0xff] }
  0x12   :  { %252 = vmatprep.subr.mxu0 %v88_v30  ;;  %399 = vmatprep.subr.mxu1 %v154_v31  ;;  %v144_v51 = vld [vmem:[%s2266_s0 + $0x238] sm:$0xff]  ;;  %v77_v52 = vld [vmem:[%s2266_s0 + $0x20] sm:$0xff]  ;;  %v143_v53 = vld [vmem:[%s2266_s0 + $0x230] sm:$0xff] }
  0x13   :  { %253 = vmatpush1.msra.mxu0 %v87_v32  ;;  %400 = vmatpush1.msra.mxu1 %v153_v33  ;;  %v76_v54 = vld [vmem:[%s2266_s0 + $0x18] sm:$0xff]  ;;  %v142_v55 = vld [vmem:[%s2266_s0 + $0x228] sm:$0xff]  ;;  %v75_v56 = vld [vmem:[%s2266_s0 + $0x10] sm:$0xff] }
  0x14   :  { %254 = vmatprep.subr.mxu0 %v86_v34  ;;  %401 = vmatprep.subr.mxu1 %v152_v35  ;;  %v141_v57 = vld [vmem:[%s2266_s0 + $0x220] sm:$0xff]  ;;  %v74_v58 = vld [vmem:[%s2266_s0 + $0x8] sm:$0xff]  ;;  %v140_v59 = vld [vmem:[%s2266_s0 + $0x218] sm:$0xff] }
  0x15   :  { %255 = vmatpush1.msra.mxu0 %v85_v36  ;;  %402 = vmatpush1.msra.mxu1 %v151_v37  ;;  %v73_v60 = vld [vmem:[%s2266_s0] sm:$0xff]  ;;  %v139_v61 = vld [vmem:[%s2266_s0 + $0x210] sm:$0xff]  ;;  %v136_v62 = vld [vmem:[%s2266_s0 + $0x1f8] sm:$0xff] }
  0x16   :  { %256 = vmatprep.subr.mxu0 %v84_v38  ;;  %403 = vmatprep.subr.mxu1 %v150_v39  ;;  %v138_v63 = vld [vmem:[%s2266_s0 + $0x208] sm:$0xff]  ;;  %v135_v0 = vld [vmem:[%s2266_s0 + $0x1f0] sm:$0xff]  ;;  %v137_v1 = vld [vmem:[%s2266_s0 + $0x200] sm:$0xff] }
  0x17   :  { %257 = vmatpush1.msra.mxu0 %v83_v40  ;;  %404 = vmatpush1.msra.mxu1 %v149_v41  ;;  %v134_v2 = vld [vmem:[%s2266_s0 + $0x1e8] sm:$0xff]  ;;  %v192_v3 = vld [vmem:[%s2266_s0 + $0x3b8] sm:$0xff]  ;;  %v133_v4 = vld [vmem:[%s2266_s0 + $0x1e0] sm:$0xff] }
  0x18   :  { %258 = vmatprep.subr.mxu0 %v82_v42  ;;  %405 = vmatprep.subr.mxu1 %v148_v43  ;;  %v191_v5 = vld [vmem:[%s2266_s0 + $0x3b0] sm:$0xff]  ;;  %v132_v6 = vld [vmem:[%s2266_s0 + $0x1d8] sm:$0xff]  ;;  %v190_v7 = vld [vmem:[%s2266_s0 + $0x3a8] sm:$0xff] }
  0x19   :  { %259 = vmatpush1.msra.mxu0 %v81_v44  ;;  %406 = vmatpush1.msra.mxu1 %v147_v45  ;;  %v131_v8 = vld [vmem:[%s2266_s0 + $0x1d0] sm:$0xff]  ;;  %v189_v9 = vld [vmem:[%s2266_s0 + $0x3a0] sm:$0xff]  ;;  %v130_v10 = vld [vmem:[%s2266_s0 + $0x1c8] sm:$0xff] }
  0x1a   :  { %260 = vmatprep.subr.mxu0 %v80_v46  ;;  %407 = vmatprep.subr.mxu1 %v146_v47  ;;  %v188_v11 = vld [vmem:[%s2266_s0 + $0x398] sm:$0xff]  ;;  %v129_v12 = vld [vmem:[%s2266_s0 + $0x1c0] sm:$0xff]  ;;  %v187_v13 = vld [vmem:[%s2266_s0 + $0x390] sm:$0xff] }
  0x1b   :  { %261 = vmatpush1.msra.mxu0 %v79_v48  ;;  %408 = vmatpush1.msra.mxu1 %v145_v49  ;;  %v128_v14 = vld [vmem:[%s2266_s0 + $0x1b8] sm:$0xff]  ;;  %v186_v15 = vld [vmem:[%s2266_s0 + $0x388] sm:$0xff]  ;;  %v127_v16 = vld [vmem:[%s2266_s0 + $0x1b0] sm:$0xff] }
  0x1c   :  { %262 = vmatprep.subr.mxu0 %v78_v50  ;;  %409 = vmatprep.subr.mxu1 %v144_v51  ;;  %v185_v17 = vld [vmem:[%s2266_s0 + $0x380] sm:$0xff]  ;;  %v126_v18 = vld [vmem:[%s2266_s0 + $0x1a8] sm:$0xff]  ;;  %v184_v19 = vld [vmem:[%s2266_s0 + $0x378] sm:$0xff] }
  0x1d   :  { %263 = vmatpush1.msra.mxu0 %v77_v52  ;;  %410 = vmatpush1.msra.mxu1 %v143_v53  ;;  %v125_v20 = vld [vmem:[%s2266_s0 + $0x1a0] sm:$0xff]  ;;  %v183_v21 = vld [vmem:[%s2266_s0 + $0x370] sm:$0xff]  ;;  %v124_v22 = vld [vmem:[%s2266_s0 + $0x198] sm:$0xff] }
  0x1e   :  { %264 = vmatprep.subr.mxu0 %v76_v54  ;;  %411 = vmatprep.subr.mxu1 %v142_v55  ;;  %v182_v23 = vld [vmem:[%s2266_s0 + $0x368] sm:$0xff]  ;;  %v123_v24 = vld [vmem:[%s2266_s0 + $0x190] sm:$0xff]  ;;  %v181_v25 = vld [vmem:[%s2266_s0 + $0x360] sm:$0xff] }
  0x1f   :  { %265 = vmatpush1.msra.mxu0 %v75_v56  ;;  %412 = vmatpush1.msra.mxu1 %v141_v57  ;;  %v122_v26 = vld [vmem:[%s2266_s0 + $0x188] sm:$0xff]  ;;  %v180_v27 = vld [vmem:[%s2266_s0 + $0x358] sm:$0xff]  ;;  %v121_v28 = vld [vmem:[%s2266_s0 + $0x180] sm:$0xff] }
  0x20   :  { %266 = vmatprep.subr.mxu0 %v74_v58  ;;  %413 = vmatprep.subr.mxu1 %v140_v59  ;;  %v179_v29 = vld [vmem:[%s2266_s0 + $0x350] sm:$0xff]  ;;  %v120_v30 = vld [vmem:[%s2266_s0 + $0x178] sm:$0xff]  ;;  %v178_v31 = vld [vmem:[%s2266_s0 + $0x348] sm:$0xff] }
  0x21   :  { %267 = vmatpush1.msra.mxu0 %v73_v60  ;;  %414 = vmatpush1.msra.mxu1 %v139_v61  ;;  %v119_v32 = vld [vmem:[%s2266_s0 + $0x170] sm:$0xff]  ;;  %v177_v33 = vld [vmem:[%s2266_s0 + $0x340] sm:$0xff]  ;;  %v118_v34 = vld [vmem:[%s2266_s0 + $0x168] sm:$0xff] }
  0x22   :  { %268 = vmatprep.subr.mxu0 %v136_v62  ;;  %415 = vmatprep.subr.mxu1 %v138_v63  ;;  %v176_v35 = vld [vmem:[%s2266_s0 + $0x338] sm:$0xff]  ;;  %v117_v36 = vld [vmem:[%s2266_s0 + $0x160] sm:$0xff]  ;;  %v175_v37 = vld [vmem:[%s2266_s0 + $0x330] sm:$0xff] }
  0x23   :  { %269 = vmatpush2.msra.mxu0 %v135_v0  ;;  %416 = vmatpush1.msra.mxu1 %v137_v1  ;;  %v116_v38 = vld [vmem:[%s2266_s0 + $0x158] sm:$0xff]  ;;  %v174_v39 = vld [vmem:[%s2266_s0 + $0x328] sm:$0xff]  ;;  %v115_v40 = vld [vmem:[%s2266_s0 + $0x150] sm:$0xff] }
  0x24   :  { %270 = vmatprep.subr.mxu0 %v134_v2  ;;  %425 = vmatprep.subr.mxu1 %v192_v3  ;;  %v173_v41 = vld [vmem:[%s2266_s0 + $0x320] sm:$0xff]  ;;  %v114_v42 = vld [vmem:[%s2266_s0 + $0x148] sm:$0xff]  ;;  %v172_v43 = vld [vmem:[%s2266_s0 + $0x318] sm:$0xff] }
  0x25   :  { %271 = vmatpush2.msra.mxu0 %v133_v4  ;;  %426 = vmatpush2.msra.mxu1 %v191_v5  ;;  %v113_v44 = vld [vmem:[%s2266_s0 + $0x140] sm:$0xff]  ;;  %v171_v45 = vld [vmem:[%s2266_s0 + $0x310] sm:$0xff]  ;;  %v112_v46 = vld [vmem:[%s2266_s0 + $0x138] sm:$0xff] }
  0x26   :  { %272 = vmatprep.subr.mxu0 %v132_v6  ;;  %427 = vmatprep.subr.mxu1 %v190_v7  ;;  %v170_v47 = vld [vmem:[%s2266_s0 + $0x308] sm:$0xff]  ;;  %v111_v48 = vld [vmem:[%s2266_s0 + $0x130] sm:$0xff]  ;;  %v169_v49 = vld [vmem:[%s2266_s0 + $0x300] sm:$0xff] }
  0x27   :  { %273 = vmatpush2.msra.mxu0 %v131_v8  ;;  %428 = vmatpush2.msra.mxu1 %v189_v9  ;;  %v110_v50 = vld [vmem:[%s2266_s0 + $0x128] sm:$0xff]  ;;  %v20_v51 = vld [vmem:[%s2267_s1 + $0x18] sm:$0xff]  ;;  %v109_v52 = vld [vmem:[%s2266_s0 + $0x120] sm:$0xff] }
  0x28   :  { %274 = vmatprep.subr.mxu0 %v130_v10  ;;  %429 = vmatprep.subr.mxu1 %v188_v11  ;;  %v19_v53 = vld [vmem:[%s2267_s1 + $0x10] sm:$0xff]  ;;  %v108_v54 = vld [vmem:[%s2266_s0 + $0x118] sm:$0xff]  ;;  %v18_v55 = vld [vmem:[%s2267_s1 + $0x8] sm:$0xff] }
  0x29   :  { %275 = vmatpush2.msra.mxu0 %v129_v12  ;;  %430 = vmatpush2.msra.mxu1 %v187_v13  ;;  %v107_v56 = vld [vmem:[%s2266_s0 + $0x110] sm:$0xff]  ;;  %v24_v57 = vld [vmem:[%s2267_s1 + $0x38] sm:$0xff]  ;;  %v106_v58 = vld [vmem:[%s2266_s0 + $0x108] sm:$0xff] }
  0x2a   :  { %276 = vmatprep.subr.mxu0 %v128_v14  ;;  %431 = vmatprep.subr.mxu1 %v186_v15  ;;  %v105_v59 = vld [vmem:[%s2266_s0 + $0x100] sm:$0xff]  ;;  %v23_v60 = vld [vmem:[%s2267_s1 + $0x30] sm:$0xff]  ;;  %v28_v62 = vld [vmem:[%s2267_s1 + $0x58] sm:$0xff] }
  0x2b   :  { %277 = vmatpush2.msra.mxu0 %v127_v16  ;;  %432 = vmatpush2.msra.mxu1 %v185_v17  ;;  %v17_v61 = vld [vmem:[%s2267_s1] sm:$0xff]  ;;  %v22_v63 = vld [vmem:[%s2267_s1 + $0x28] sm:$0xff]  ;;  %v27_v0 = vld [vmem:[%s2267_s1 + $0x50] sm:$0xff] }
  0x2c   :  { %278 = vmatprep.subr.mxu0 %v126_v18  ;;  %433 = vmatprep.subr.mxu1 %v184_v19  ;;  %v21_v1 = vld [vmem:[%s2267_s1 + $0x20] sm:$0xff]  ;;  %v32_v2 = vld [vmem:[%s2267_s1 + $0x78] sm:$0xff]  ;;  %v26_v3 = vld [vmem:[%s2267_s1 + $0x48] sm:$0xff] }
  0x2d   :  { %279 = vmatpush2.msra.mxu0 %v125_v20  ;;  %434 = vmatpush2.msra.mxu1 %v183_v21  ;;  %v31_v4 = vld [vmem:[%s2267_s1 + $0x70] sm:$0xff]  ;;  %v25_v5 = vld [vmem:[%s2267_s1 + $0x40] sm:$0xff]  ;;  %v36_v6 = vld [vmem:[%s2267_s1 + $0x98] sm:$0xff] }
  0x2e   :  { %280 = vmatprep.subr.mxu0 %v124_v22  ;;  %435 = vmatprep.subr.mxu1 %v182_v23  ;;  %v30_v7 = vld [vmem:[%s2267_s1 + $0x68] sm:$0xff]  ;;  %v35_v8 = vld [vmem:[%s2267_s1 + $0x90] sm:$0xff]  ;;  %v29_v9 = vld [vmem:[%s2267_s1 + $0x60] sm:$0xff] }
  0x2f   :  { %281 = vmatpush2.msra.mxu0 %v123_v24  ;;  %436 = vmatpush2.msra.mxu1 %v181_v25  ;;  %v40_v10 = vld [vmem:[%s2267_s1 + $0xb8] sm:$0xff]  ;;  %v34_v11 = vld [vmem:[%s2267_s1 + $0x88] sm:$0xff]  ;;  %v39_v12 = vld [vmem:[%s2267_s1 + $0xb0] sm:$0xff] }
  0x30   :  { %282 = vmatprep.subr.mxu0 %v122_v26  ;;  %437 = vmatprep.subr.mxu1 %v180_v27  ;;  %v33_v13 = vld [vmem:[%s2267_s1 + $0x80] sm:$0xff]  ;;  %v44_v14 = vld [vmem:[%s2267_s1 + $0xd8] sm:$0xff]  ;;  %v38_v15 = vld [vmem:[%s2267_s1 + $0xa8] sm:$0xff] }
  0x31   :  { %283 = vmatpush2.msra.mxu0 %v121_v28  ;;  %438 = vmatpush2.msra.mxu1 %v179_v29  ;;  %v43_v16 = vld [vmem:[%s2267_s1 + $0xd0] sm:$0xff]  ;;  %v37_v17 = vld [vmem:[%s2267_s1 + $0xa0] sm:$0xff]  ;;  %v48_v18 = vld [vmem:[%s2267_s1 + $0xf8] sm:$0xff] }
  0x32   :  { %284 = vmatprep.subr.mxu0 %v120_v30  ;;  %439 = vmatprep.subr.mxu1 %v178_v31  ;;  %v42_v19 = vld [vmem:[%s2267_s1 + $0xc8] sm:$0xff]  ;;  %v47_v20 = vld [vmem:[%s2267_s1 + $0xf0] sm:$0xff]  ;;  %v41_v21 = vld [vmem:[%s2267_s1 + $0xc0] sm:$0xff] }
  0x33   :  { %285 = vmatpush2.msra.mxu0 %v119_v32  ;;  %440 = vmatpush2.msra.mxu1 %v177_v33  ;;  %v52_v22 = vld [vmem:[%s2267_s1 + $0x118] sm:$0xff]  ;;  %v46_v23 = vld [vmem:[%s2267_s1 + $0xe8] sm:$0xff]  ;;  %v51_v24 = vld [vmem:[%s2267_s1 + $0x110] sm:$0xff] }
  0x34   :  { %286 = vmatprep.subr.mxu0 %v118_v34  ;;  %441 = vmatprep.subr.mxu1 %v176_v35  ;;  %v45_v25 = vld [vmem:[%s2267_s1 + $0xe0] sm:$0xff]  ;;  %v56_v26 = vld [vmem:[%s2267_s1 + $0x138] sm:$0xff]  ;;  %v50_v27 = vld [vmem:[%s2267_s1 + $0x108] sm:$0xff] }
  0x35   :  { %287 = vmatpush2.msra.mxu0 %v117_v36  ;;  %442 = vmatpush2.msra.mxu1 %v175_v37  ;;  %v55_v28 = vld [vmem:[%s2267_s1 + $0x130] sm:$0xff]  ;;  %v49_v29 = vld [vmem:[%s2267_s1 + $0x100] sm:$0xff]  ;;  %v60_v30 = vld [vmem:[%s2267_s1 + $0x158] sm:$0xff] }
  0x36   :  { %288 = vmatprep.subr.mxu0 %v116_v38  ;;  %443 = vmatprep.subr.mxu1 %v174_v39  ;;  %v54_v31 = vld [vmem:[%s2267_s1 + $0x128] sm:$0xff]  ;;  %v59_v32 = vld [vmem:[%s2267_s1 + $0x150] sm:$0xff]  ;;  %v53_v33 = vld [vmem:[%s2267_s1 + $0x120] sm:$0xff] }
  0x37   :  { %289 = vmatpush2.msra.mxu0 %v115_v40  ;;  %444 = vmatpush2.msra.mxu1 %v173_v41  ;;  %v64_v34 = vld [vmem:[%s2267_s1 + $0x178] sm:$0xff]  ;;  %v58_v35 = vld [vmem:[%s2267_s1 + $0x148] sm:$0xff]  ;;  %v63_v36 = vld [vmem:[%s2267_s1 + $0x170] sm:$0xff] }
  0x38   :  { %290 = vmatprep.subr.mxu0 %v114_v42  ;;  %445 = vmatprep.subr.mxu1 %v172_v43  ;;  %v57_v37 = vld [vmem:[%s2267_s1 + $0x140] sm:$0xff]  ;;  %v68_v38 = vld [vmem:[%s2267_s1 + $0x198] sm:$0xff]  ;;  %v62_v39 = vld [vmem:[%s2267_s1 + $0x168] sm:$0xff] }
  0x39   :  { %291 = vmatpush2.msra.mxu0 %v113_v44  ;;  %446 = vmatpush2.msra.mxu1 %v171_v45  ;;  %v67_v40 = vld [vmem:[%s2267_s1 + $0x190] sm:$0xff]  ;;  %v61_v41 = vld [vmem:[%s2267_s1 + $0x160] sm:$0xff]  ;;  %v72_v42 = vld [vmem:[%s2267_s1 + $0x1b8] sm:$0xff] }
  0x3a   :  { %292 = vmatprep.subr.mxu0 %v112_v46  ;;  %447 = vmatprep.subr.mxu1 %v170_v47  ;;  %v66_v43 = vld [vmem:[%s2267_s1 + $0x188] sm:$0xff]  ;;  %v71_v44 = vld [vmem:[%s2267_s1 + $0x1b0] sm:$0xff]  ;;  %v65_v45 = vld [vmem:[%s2267_s1 + $0x180] sm:$0xff] }
  0x3b   :  { %293 = vmatpush2.msra.mxu0 %v111_v48  ;;  %448 = vmatpush2.msra.mxu1 %v169_v49  ;;  %v70_v46 = vld [vmem:[%s2267_s1 + $0x1a8] sm:$0xff]  ;;  %v69_v47 = vld [vmem:[%s2267_s1 + $0x1a0] sm:$0xff] }
  0x3c   :  { %294 = vmatprep.subr.mxu0 %v110_v50  ;;  %1071 = vmatprep.mubr.msk.f32.mxu1 %vm193_vm0, %v20_v51 }
  0x3d   :  { %295 = vmatpush2.msra.mxu0 %v109_v52  ;;  %450 = vmatmul.mubr.f32.vlgmr.msra.gmra.mxu1 %v19_v53 }
  0x3e   :  { %296 = vmatprep.subr.mxu0 %v108_v54  ;;  %300 = vmatprep.mubr.f32.mxu0 %v18_v55 }
  0x3f   :  { %297 = vmatpush2.msra.mxu0 %v107_v56  ;;  %1072 = vmatprep.mubr.msk.f32.mxu1 %vm193_vm0, %v24_v57 }
  0x40   :  { %298 = vmatprep.subr.mxu0 %v106_v58 }
  0x41   :  { %299 = vmatpush2.msra.mxu0 %v105_v59  ;;  %456 = vmatmul.mubr.f32.gmra.mxu1 %v23_v60 }
  0x42   :  { %301 = vmatmul.mubr.f32.vlgmr.msra.gmra.mxu0 %v17_v61  ;;  %1073 = vmatprep.mubr.msk.f32.mxu1 %vm193_vm0, %v28_v62 }
  0x43   :  { %306 = vmatprep.mubr.f32.mxu0 %v22_v63 }
  0x45   :  { %462 = vmatmul.mubr.f32.gmra.mxu1 %v27_v0 }
  0x46   :  { %307 = vmatmul.mubr.f32.gmra.mxu0 %v21_v1  ;;  %1074 = vmatprep.mubr.msk.f32.mxu1 %vm193_vm0, %v32_v2 }
  0x47   :  { %312 = vmatprep.mubr.f32.mxu0 %v26_v3 }
  0x49   :  { %468 = vmatmul.mubr.f32.gmra.mxu1 %v31_v4 }
  0x4a   :  { %313 = vmatmul.mubr.f32.gmra.mxu0 %v25_v5  ;;  %1075 = vmatprep.mubr.msk.f32.mxu1 %vm193_vm0, %v36_v6 }
  0x4b   :  { %318 = vmatprep.mubr.f32.mxu0 %v30_v7 }
  0x4d   :  { %474 = vmatmul.mubr.f32.gmra.mxu1 %v35_v8 }
  0x4e   :  { %319 = vmatmul.mubr.f32.gmra.mxu0 %v29_v9  ;;  %1076 = vmatprep.mubr.msk.f32.mxu1 %vm193_vm0, %v40_v10 }
  0x4f   :  { %324 = vmatprep.mubr.f32.mxu0 %v34_v11 }
  0x51   :  { %480 = vmatmul.mubr.f32.gmra.mxu1 %v39_v12 }
  0x52   :  { %325 = vmatmul.mubr.f32.gmra.mxu0 %v33_v13  ;;  %1077 = vmatprep.mubr.msk.f32.mxu1 %vm193_vm0, %v44_v14 }
  0x53   :  { %330 = vmatprep.mubr.f32.mxu0 %v38_v15 }
  0x55   :  { %486 = vmatmul.mubr.f32.gmra.mxu1 %v43_v16 }
  0x56   :  { %331 = vmatmul.mubr.f32.gmra.mxu0 %v37_v17  ;;  %1078 = vmatprep.mubr.msk.f32.mxu1 %vm193_vm0, %v48_v18 }
  0x57   :  { %336 = vmatprep.mubr.f32.mxu0 %v42_v19 }
  0x59   :  { %492 = vmatmul.mubr.f32.gmra.mxu1 %v47_v20 }
  0x5a   :  { %337 = vmatmul.mubr.f32.gmra.mxu0 %v41_v21  ;;  %1079 = vmatprep.mubr.msk.f32.mxu1 %vm193_vm0, %v52_v22 }
  0x5b   :  { %342 = vmatprep.mubr.f32.mxu0 %v46_v23 }
  0x5d   :  { %498 = vmatmul.mubr.f32.gmra.mxu1 %v51_v24 }
  0x5e   :  { %343 = vmatmul.mubr.f32.gmra.mxu0 %v45_v25  ;;  %1080 = vmatprep.mubr.msk.f32.mxu1 %vm193_vm0, %v56_v26 }
  0x5f   :  { %348 = vmatprep.mubr.f32.mxu0 %v50_v27 }
  0x61   :  { %504 = vmatmul.mubr.f32.gmra.mxu1 %v55_v28 }
  0x62   :  { %349 = vmatmul.mubr.f32.gmra.mxu0 %v49_v29  ;;  %1081 = vmatprep.mubr.msk.f32.mxu1 %vm193_vm0, %v60_v30 }
  0x63   :  { %354 = vmatprep.mubr.f32.mxu0 %v54_v31 }
  0x65   :  { %510 = vmatmul.mubr.f32.gmra.mxu1 %v59_v32 }
  0x66   :  { %355 = vmatmul.mubr.f32.gmra.mxu0 %v53_v33  ;;  %1082 = vmatprep.mubr.msk.f32.mxu1 %vm193_vm0, %v64_v34 }
  0x67   :  { %360 = vmatprep.mubr.f32.mxu0 %v58_v35 }
  0x69   :  { %516 = vmatmul.mubr.f32.gmra.mxu1 %v63_v36 }
  0x6a   :  { %361 = vmatmul.mubr.f32.gmra.mxu0 %v57_v37  ;;  %1083 = vmatprep.mubr.msk.f32.mxu1 %vm193_vm0, %v68_v38 }
  0x6b   :  { %366 = vmatprep.mubr.f32.mxu0 %v62_v39 }
  0x6d   :  { %522 = vmatmul.mubr.f32.gmra.mxu1 %v67_v40 }
  0x6e   :  { %367 = vmatmul.mubr.f32.gmra.mxu0 %v61_v41  ;;  %1084 = vmatprep.mubr.msk.f32.mxu1 %vm193_vm0, %v72_v42 }
  0x6f   :  { %372 = vmatprep.mubr.f32.mxu0 %v66_v43 }
  0x71   :  { %528 = vmatmul.mubr.f32.gmra.mxu1 %v71_v44 }
  0x72   :  { %373 = vmatmul.mubr.f32.gmra.mxu0 %v65_v45 }
  0x73   :  { %378 = vmatprep.mubr.f32.mxu0 %v70_v46 }
  0x76   :  { %379 = vmatmul.mubr.f32.gmra.mxu0 %v69_v47 }
  0xfd   :  { %v451_v48 = vpop.f32.mrf.mxu1 }
  0xff   :  { %v453_v49 = vpop.f32.mrf.mxu1 }
 0x101   :  { %v457_v50 = vpop.f32.mrf.mxu1 }
 0x102   :  { %v302_v51 = vpop.f32.mrf.mxu0 }
 0x103   :  { %v459_v52 = vpop.f32.mrf.mxu1  ;;  %v1692_v56 = vadd.f32 %v451_v48, %v302_v51 }
 0x104   :  { %v304_v53 = vpop.f32.mrf.mxu0 }
 0x105   :  { %v1690_v54 = vadd.f32 %v453_v49, %v304_v53  ;;  %v463_v55 = vpop.f32.mrf.mxu1 }
 0x106   :  { %v308_v57 = vpop.f32.mrf.mxu0 }
 0x107   :  { %v465_v58 = vpop.f32.mrf.mxu1  ;;  %v535_v59 = vsel %vm534_vm1, %v1690_v54, 0.0  ;;  %v1699_v0 = vadd.f32 %v457_v50, %v308_v57 }
 0x108   :  { %v310_v60 = vpop.f32.mrf.mxu0  ;;  %v536_v61 = vadd.f32 %v535_v59, %v1692_v56 }
 0x109   :  { %v1697_v62 = vadd.f32 %v459_v52, %v310_v60  ;;  %v469_v63 = vpop.f32.mrf.mxu1 }
 0x10a   :  { %537 = vadd.xlane.f32.xlu0 %v536_v61  ;;  %v314_v1 = vpop.f32.mrf.mxu0 }
 0x10b   :  { %v471_v2 = vpop.f32.mrf.mxu1  ;;  %v539_v3 = vsel %vm534_vm1, %v1697_v62, 0.0  ;;  %v1706_v8 = vadd.f32 %v463_v55, %v314_v1 }
 0x10c   :  { %v316_v4 = vpop.f32.mrf.mxu0  ;;  %v540_v5 = vadd.f32 %v539_v3, %v1699_v0 }
 0x10d   :  { %v1704_v6 = vadd.f32 %v465_v58, %v316_v4  ;;  %v475_v7 = vpop.f32.mrf.mxu1 }
 0x10e   :  { %541 = vadd.xlane.f32.xlu0 %v540_v5  ;;  %v320_v9 = vpop.f32.mrf.mxu0 }
 0x10f   :  { %v477_v10 = vpop.f32.mrf.mxu1  ;;  %v543_v11 = vsel %vm534_vm1, %v1704_v6, 0.0  ;;  %v1713_v16 = vadd.f32 %v469_v63, %v320_v9 }
 0x110   :  { %v322_v12 = vpop.f32.mrf.mxu0  ;;  %v544_v13 = vadd.f32 %v543_v11, %v1706_v8 }
 0x111   :  { %v1711_v14 = vadd.f32 %v471_v2, %v322_v12  ;;  %v481_v15 = vpop.f32.mrf.mxu1 }
 0x112   :  { %545 = vadd.xlane.f32.xlu1 %v544_v13  ;;  %v326_v17 = vpop.f32.mrf.mxu0 }
 0x113   :  { %v483_v18 = vpop.f32.mrf.mxu1  ;;  %v547_v19 = vsel %vm534_vm1, %v1711_v14, 0.0  ;;  %v1720_v24 = vadd.f32 %v475_v7, %v326_v17 }
 0x114   :  { %v328_v20 = vpop.f32.mrf.mxu0  ;;  %v548_v21 = vadd.f32 %v547_v19, %v1713_v16 }
 0x115   :  { %v1718_v22 = vadd.f32 %v477_v10, %v328_v20  ;;  %v487_v23 = vpop.f32.mrf.mxu1 }
 0x116   :  { %549 = vadd.xlane.f32.xlu1 %v548_v21  ;;  %v332_v25 = vpop.f32.mrf.mxu0 }
 0x117   :  { %v489_v26 = vpop.f32.mrf.mxu1  ;;  %v551_v27 = vsel %vm534_vm1, %v1718_v22, 0.0  ;;  %v1727_v32 = vadd.f32 %v481_v15, %v332_v25 }
 0x118   :  { %v334_v28 = vpop.f32.mrf.mxu0  ;;  %v552_v29 = vadd.f32 %v551_v27, %v1720_v24 }
 0x119   :  { %v1725_v30 = vadd.f32 %v483_v18, %v334_v28  ;;  %v493_v31 = vpop.f32.mrf.mxu1 }
 0x11a   :  { %553 = vadd.xlane.f32.xlu0 %v552_v29  ;;  %v338_v33 = vpop.f32.mrf.mxu0 }
 0x11b   :  { %v495_v34 = vpop.f32.mrf.mxu1  ;;  %v555_v35 = vsel %vm534_vm1, %v1725_v30, 0.0  ;;  %v1734_v40 = vadd.f32 %v487_v23, %v338_v33 }
 0x11c   :  { %v340_v36 = vpop.f32.mrf.mxu0  ;;  %v556_v37 = vadd.f32 %v555_v35, %v1727_v32 }
 0x11d   :  { %v1732_v38 = vadd.f32 %v489_v26, %v340_v36  ;;  %v499_v39 = vpop.f32.mrf.mxu1 }
 0x11e   :  { %557 = vadd.xlane.f32.xlu1 %v556_v37  ;;  %v344_v41 = vpop.f32.mrf.mxu0 }
 0x11f   :  { %v501_v42 = vpop.f32.mrf.mxu1  ;;  %v559_v43 = vsel %vm534_vm1, %v1732_v38, 0.0  ;;  %v1741_v48 = vadd.f32 %v493_v31, %v344_v41 }
 0x120   :  { %v346_v44 = vpop.f32.mrf.mxu0  ;;  %v560_v45 = vadd.f32 %v559_v43, %v1734_v40 }
 0x121   :  { %v1739_v46 = vadd.f32 %v495_v34, %v346_v44  ;;  %v505_v47 = vpop.f32.mrf.mxu1 }
 0x122   :  { %561 = vadd.xlane.f32.xlu0 %v560_v45  ;;  %v350_v49 = vpop.f32.mrf.mxu0 }
 0x123   :  { %v507_v50 = vpop.f32.mrf.mxu1  ;;  %v563_v51 = vsel %vm534_vm1, %v1739_v46, 0.0  ;;  %v1748_v58 = vadd.f32 %v499_v39, %v350_v49 }
 0x124   :  { %v352_v52 = vpop.f32.mrf.mxu0  ;;  %v564_v53 = vadd.f32 %v563_v51, %v1741_v48 }
 0x125   :  { %v1746_v55 = vadd.f32 %v501_v42, %v352_v52  ;;  %v511_v57 = vpop.f32.mrf.mxu1 }
 0x126   :  { %565 = vadd.xlane.f32.xlu1 %v564_v53  ;;  %v356_v59 = vpop.f32.mrf.mxu0 }
 0x127   :  { %v513_v60 = vpop.f32.mrf.mxu1  ;;  %v567_v61 = vsel %vm534_vm1, %v1746_v55, 0.0  ;;  %v1755_v4 = vadd.f32 %v505_v47, %v356_v59  ;;  %v1121_v47 = vmov 1  }
 0x128   :  { %v358_v63 = vpop.f32.mrf.mxu0  ;;  %v568_v1 = vadd.f32 %v567_v61, %v1748_v58  ;;  %1087 = vset.pattern.permute.xlu1 %v1121_v47  ;;  %1088 = vset.pattern.permute.xlu0 %v1121_v47 }
 0x129   :  { %v1753_v2 = vadd.f32 %v507_v50, %v358_v63  ;;  %v517_v3 = vpop.f32.mrf.mxu1 }
 0x12a   :  { %569 = vadd.xlane.f32.xlu0 %v568_v1  ;;  %v362_v5 = vpop.f32.mrf.mxu0 }
 0x12b   :  { %v519_v7 = vpop.f32.mrf.mxu1  ;;  %v571_v9 = vsel %vm534_vm1, %v1753_v2, 0.0  ;;  %v1762_v15 = vadd.f32 %v511_v57, %v362_v5 }
 0x12c   :  { %v364_v10 = vpop.f32.mrf.mxu0  ;;  %v572_v11 = vadd.f32 %v571_v9, %v1755_v4 }
 0x12d   :  { %v1760_v12 = vadd.f32 %v513_v60, %v364_v10  ;;  %v523_v13 = vpop.f32.mrf.mxu1 }
 0x12e   :  { %573 = vadd.xlane.f32.xlu1 %v572_v11  ;;  %v368_v17 = vpop.f32.mrf.mxu0 }
 0x12f   :  { %v575_v18 = vsel %vm534_vm1, %v1760_v12, 0.0  ;;  %v525_v19 = vpop.f32.mrf.mxu1  ;;  %v1769_v25 = vadd.f32 %v517_v3, %v368_v17 }
 0x130   :  { %v370_v20 = vpop.f32.mrf.mxu0  ;;  %v576_v21 = vadd.f32 %v575_v18, %v1762_v15 }
 0x131   :  { %v1767_v23 = vadd.f32 %v519_v7, %v370_v20  ;;  %v529_v27 = vpop.f32.mrf.mxu1 }
 0x132   :  { %577 = vadd.xlane.f32.xlu0 %v576_v21  ;;  %v374_v26 = vpop.f32.mrf.mxu0 }
 0x133   :  { %v579_v28 = vsel %vm534_vm1, %v1767_v23, 0.0  ;;  %v1773_v29 = vadd.f32 %v523_v13, %v374_v26  ;;  %v531_v36 = vpop.f32.mrf.mxu1 }
 0x134   :  { %v376_v31 = vpop.f32.mrf.mxu0  ;;  %v580_v33 = vadd.f32 %v579_v28, %v1769_v25 }
 0x135   :  { %v1776_v34 = vadd.f32 %v525_v19, %v376_v31 }
 0x136   :  { %581 = vadd.xlane.f32.xlu1 %v580_v33  ;;  %v380_v35 = vpop.f32.mrf.mxu0 }
 0x137   :  { %v583_v37 = vsel %vm534_vm1, %v1776_v34, 0.0  ;;  %v1780_v39 = vadd.f32 %v529_v27, %v380_v35 }
 0x138   :  { %v382_v41 = vpop.f32.mrf.mxu0  ;;  %v584_v42 = vadd.f32 %v583_v37, %v1773_v29 }
 0x139   :  { %v1783_v43 = vadd.f32 %v531_v36, %v382_v41 }
 0x13a   :  { %585 = vadd.xlane.f32.xlu0 %v584_v42 }
 0x13b   :  { %v587_v44 = vsel %vm534_vm1, %v1783_v43, 0.0 }
 0x13c   :  { %v588_v45 = vadd.f32 %v587_v44, %v1780_v39 }
 0x13e   :  { %589 = vadd.xlane.f32.xlu1 %v588_v45 }
 0x193   :  { %v538_v49 = vpop.xlane.xlu0 %537 }
 0x194   :  { %v591_v50 = vmul.f32 0.0051020407, %v538_v49 }
 0x196   :  { %v1791_v51 = vsub.f32 %v1692_v56, %v591_v50  ;;  %v1794_v52 = vsub.f32 %v1690_v54, %v591_v50 }
 0x197   :  { %v542_v53 = vpop.xlane.xlu0 %541 }
 0x198   :  { %v592_v57 = vmul.f32 0.0051020407, %v542_v53  ;;  %v633_v59 = vmul.f32 %v1791_v51, %v1791_v51  ;;  %v634_v60 = vmul.f32 %v1794_v52, %v1794_v52 }
 0x19a   :  { %v1801_v61 = vsub.f32 %v1699_v0, %v592_v57  ;;  %v1804_v63 = vsub.f32 %v1697_v62, %v592_v57  ;;  %v661_v56 = vsel %vm534_vm1, %v634_v60, 0.0 }
 0x19b   :  { %v546_v1 = vpop.xlane.xlu1 %545  ;;  %v662_v3 = vadd.f32 %v661_v56, %v633_v59 }
 0x19c   :  { %v593_v54 = vmul.f32 0.0051020407, %v546_v1  ;;  %v635_v5 = vmul.f32 %v1801_v61, %v1801_v61  ;;  %v636_v7 = vmul.f32 %v1804_v63, %v1804_v63 }
 0x19d   :  { %663 = vadd.xlane.f32.xlu0 %v662_v3 }
 0x19e   :  { %v1812_v9 = vsub.f32 %v1706_v8, %v593_v54  ;;  %v1815_v0 = vsub.f32 %v1704_v6, %v593_v54  ;;  %v665_v62 = vsel %vm534_vm1, %v636_v7, 0.0 }
 0x19f   :  { %v550_v10 = vpop.xlane.xlu1 %549  ;;  %v666_v11 = vadd.f32 %v665_v62, %v635_v5 }
 0x1a0   :  { %v594_v13 = vmul.f32 0.0051020407, %v550_v10  ;;  %v637_v17 = vmul.f32 %v1812_v9, %v1812_v9  ;;  %v638_v18 = vmul.f32 %v1815_v0, %v1815_v0 }
 0x1a1   :  { %667 = vadd.xlane.f32.xlu1 %v666_v11 }
 0x1a2   :  { %v1823_v19 = vsub.f32 %v1713_v16, %v594_v13  ;;  %v1826_v8 = vsub.f32 %v1711_v14, %v594_v13  ;;  %v669_v6 = vsel %vm534_vm1, %v638_v18, 0.0 }
 0x1a3   :  { %v554_v20 = vpop.xlane.xlu0 %553  ;;  %v670_v21 = vadd.f32 %v669_v6, %v637_v17 }
 0x1a4   :  { %v595_v26 = vmul.f32 0.0051020407, %v554_v20  ;;  %v639_v27 = vmul.f32 %v1823_v19, %v1823_v19  ;;  %v640_v28 = vmul.f32 %v1826_v8, %v1826_v8 }
 0x1a5   :  { %671 = vadd.xlane.f32.xlu0 %v670_v21 }
 0x1a6   :  { %v1834_v31 = vsub.f32 %v1720_v24, %v595_v26  ;;  %v1837_v16 = vsub.f32 %v1718_v22, %v595_v26  ;;  %v673_v14 = vsel %vm534_vm1, %v640_v28, 0.0 }
 0x1a7   :  { %v558_v33 = vpop.xlane.xlu1 %557  ;;  %v674_v35 = vadd.f32 %v673_v14, %v639_v27 }
 0x1a8   :  { %v596_v36 = vmul.f32 0.0051020407, %v558_v33  ;;  %v641_v37 = vmul.f32 %v1834_v31, %v1834_v31  ;;  %v642_v41 = vmul.f32 %v1837_v16, %v1837_v16 }
 0x1a9   :  { %675 = vadd.xlane.f32.xlu1 %v674_v35 }
 0x1aa   :  { %v1845_v42 = vsub.f32 %v1727_v32, %v596_v36  ;;  %v1848_v24 = vsub.f32 %v1725_v30, %v596_v36  ;;  %v677_v22 = vsel %vm534_vm1, %v642_v41, 0.0 }
 0x1ab   :  { %v562_v44 = vpop.xlane.xlu0 %561  ;;  %v678_v45 = vadd.f32 %v677_v22, %v641_v37 }
 0x1ac   :  { %v597_v49 = vmul.f32 0.0051020407, %v562_v44  ;;  %v643_v50 = vmul.f32 %v1845_v42, %v1845_v42  ;;  %v644_v53 = vmul.f32 %v1848_v24, %v1848_v24 }
 0x1ad   :  { %679 = vadd.xlane.f32.xlu0 %v678_v45 }
 0x1ae   :  { %v1856_v57 = vsub.f32 %v1734_v40, %v597_v49  ;;  %v1859_v32 = vsub.f32 %v1732_v38, %v597_v49  ;;  %v681_v30 = vsel %vm534_vm1, %v644_v53, 0.0 }
 0x1af   :  { %v566_v59 = vpop.xlane.xlu1 %565  ;;  %v682_v60 = vadd.f32 %v681_v30, %v643_v50 }
 0x1b0   :  { %v598_v56 = vmul.f32 0.0051020407, %v566_v59  ;;  %v645_v1 = vmul.f32 %v1856_v57, %v1856_v57  ;;  %v646_v3 = vmul.f32 %v1859_v32, %v1859_v32 }
 0x1b1   :  { %683 = vadd.xlane.f32.xlu1 %v682_v60 }
 0x1b2   :  { %v1867_v54 = vsub.f32 %v1741_v48, %v598_v56  ;;  %v1870_v40 = vsub.f32 %v1739_v46, %v598_v56  ;;  %v685_v38 = vsel %vm534_vm1, %v646_v3, 0.0 }
 0x1b3   :  { %v570_v5 = vpop.xlane.xlu0 %569  ;;  %v686_v7 = vadd.f32 %v685_v38, %v645_v1 }
 0x1b4   :  { %v599_v62 = vmul.f32 0.0051020407, %v570_v5  ;;  %v647_v10 = vmul.f32 %v1867_v54, %v1867_v54  ;;  %v648_v11 = vmul.f32 %v1870_v40, %v1870_v40 }
 0x1b5   :  { %687 = vadd.xlane.f32.xlu0 %v686_v7 }
 0x1b6   :  { %v1878_v13 = vsub.f32 %v1748_v58, %v599_v62  ;;  %v1881_v48 = vsub.f32 %v1746_v55, %v599_v62  ;;  %v689_v46 = vsel %vm534_vm1, %v648_v11, 0.0  ;;  %v760_v62 = vld [vmem:[%s2268_s3 + $0x8] sm:$0xff]  ;;  %v1954_v11 = vld [vmem:[%s2268_s3 + $0x30] sm:$0xff] }
 0x1b7   :  { %v574_v17 = vpop.xlane.xlu1 %573  ;;  %v690_v18 = vadd.f32 %v689_v46, %v647_v10  ;;  %v1948_v10 = vld [vmem:[%s2268_s3 + $0x20] sm:$0xff] }
 0x1b8   :  { %v600_v6 = vmul.f32 0.0051020407, %v574_v17  ;;  %v649_v20 = vmul.f32 %v1878_v13, %v1878_v13  ;;  %v650_v21 = vmul.f32 %v1881_v48, %v1881_v48  ;;  %v1960_v46 = vld [vmem:[%s2268_s3 + $0x40] sm:$0xff] }
 0x1b9   :  { %691 = vadd.xlane.f32.xlu1 %v690_v18  ;;  %v1966_v18 = vld [vmem:[%s2268_s3 + $0x50] sm:$0xff] }
 0x1ba   :  { %v1889_v26 = vsub.f32 %v1755_v4, %v600_v6  ;;  %v1892_v58 = vsub.f32 %v1753_v2, %v600_v6  ;;  %v693_v55 = vsel %vm534_vm1, %v650_v21, 0.0  ;;  %v1122_v21 = vmov 0  }
 0x1bb   :  { %v578_v27 = vpop.xlane.xlu0 %577  ;;  %v694_v28 = vadd.f32 %v693_v55, %v649_v20 }
 0x1bc   :  { %v601_v14 = vmul.f32 0.0051020407, %v578_v27  ;;  %v651_v33 = vmul.f32 %v1889_v26, %v1889_v26  ;;  %v652_v35 = vmul.f32 %v1892_v58, %v1892_v58 }
 0x1bd   :  { %695 = vadd.xlane.f32.xlu0 %v694_v28 }
 0x1be   :  { %v1900_v36 = vsub.f32 %v1762_v15, %v601_v14  ;;  %v1903_v4 = vsub.f32 %v1760_v12, %v601_v14  ;;  %v697_v2 = vsel %vm534_vm1, %v652_v35, 0.0  ;;  %v1992_v35 = vld [vmem:[%s2268_s3 + $0x38] sm:$0xff] }
 0x1bf   :  { %v582_v37 = vpop.xlane.xlu1 %581  ;;  %v698_v41 = vadd.f32 %v697_v2, %v651_v33  ;;  %v1998_v2 = vld [vmem:[%s2268_s3 + $0x48] sm:$0xff] }
 0x1c0   :  { %v602_v22 = vmul.f32 0.0051020407, %v582_v37  ;;  %v653_v44 = vmul.f32 %v1900_v36, %v1900_v36  ;;  %v654_v45 = vmul.f32 %v1903_v4, %v1903_v4  ;;  %v2004_v37 = vld [vmem:[%s2268_s3 + $0x58] sm:$0xff] }
 0x1c1   :  { %699 = vadd.xlane.f32.xlu1 %v698_v41 }
 0x1c2   :  { %v1911_v49 = vsub.f32 %v1769_v25, %v602_v22  ;;  %v1914_v15 = vsub.f32 %v1767_v23, %v602_v22  ;;  %v701_v12 = vsel %vm534_vm1, %v654_v45, 0.0 }
 0x1c3   :  { %v586_v50 = vpop.xlane.xlu0 %585  ;;  %v702_v53 = vadd.f32 %v701_v12, %v653_v44 }
 0x1c4   :  { %v603_v30 = vmul.f32 0.0051020407, %v586_v50  ;;  %v655_v59 = vmul.f32 %v1911_v49, %v1911_v49  ;;  %v656_v60 = vmul.f32 %v1914_v15, %v1914_v15 }
 0x1c5   :  { %703 = vadd.xlane.f32.xlu0 %v702_v53 }
 0x1c6   :  { %v1922_v56 = vsub.f32 %v1773_v29, %v603_v30  ;;  %v1925_v25 = vsub.f32 %v1776_v34, %v603_v30  ;;  %v705_v23 = vsel %vm534_vm1, %v656_v60, 0.0  ;;  %v759_v29 = vld [vmem:[%s2268_s3] sm:$0xff]  ;;  %v1939_v34 = vld [vmem:[%s2268_s3 + $0x10] sm:$0xff] }
 0x1c7   :  { %v706_v1 = vadd.f32 %v705_v23, %v655_v59  ;;  %v590_v17 = vpop.xlane.xlu1 %589 }
 0x1c8   :  { %v657_v3 = vmul.f32 %v1922_v56, %v1922_v56  ;;  %v658_v38 = vmul.f32 %v1925_v25, %v1925_v25  ;;  %v604_v6 = vmul.f32 0.0051020407, %v590_v17 }
 0x1c9   :  { %707 = vadd.xlane.f32.xlu1 %v706_v1 }
 0x1ca   :  { %v709_v5 = vsel %vm534_vm1, %v658_v38, 0.0  ;;  %v1970_v20 = vsub.f32 %v1783_v43, %v604_v6  ;;  %v1973_v55 = vsub.f32 %v1780_v39, %v604_v6  ;;  %v762_v43 = vld [vmem:[%s2268_s3 + $0x18] sm:$0xff]  ;;  %v1986_v39 = vld [vmem:[%s2268_s3 + $0x28] sm:$0xff] }
 0x1cb   :  { %v710_v7 = vadd.f32 %v709_v5, %v657_v3 }
 0x1cc   :  { %v660_v27 = vmul.f32 %v1970_v20, %v1970_v20  ;;  %v659_v28 = vmul.f32 %v1973_v55, %v1973_v55 }
 0x1cd   :  { %711 = vadd.xlane.f32.xlu0 %v710_v7 }
 0x1ce   :  { %v713_v14 = vsel %vm534_vm1, %v660_v27, 0.0 }
 0x1cf   :  { %v714_v33 = vadd.f32 %v713_v14, %v659_v28 }
 0x1da   :  { %943 = vperm.xlu1 %1087, %v759_v29  }
 0x1de   :  { %953 = vperm.xlu1 %1087, %v1939_v34  }
 0x1e3   :  { %948 = vperm.xlu0 %1088, %v760_v62  }
 0x1e7   :  { %963 = vperm.xlu0 %1088, %v1948_v10  }
 0x1eb   :  { %973 = vperm.xlu0 %1088, %v1954_v11  }
 0x1ef   :  { %983 = vperm.xlu0 %1088, %v1960_v46  }
 0x1f3   :  { %993 = vperm.xlu0 %1088, %v1966_v18  }
 0x1f7   :  { %1089 = vset.pattern.permute.xlu0 %v1122_v21 }
 0x202   :  { %715 = vadd.xlane.f32.xlu1 %v714_v33 }
 0x213   :  { %958 = vperm.xlu1 %1087, %v762_v43  }
 0x217   :  { %968 = vperm.xlu1 %1087, %v1986_v39  }
 0x21b   :  { %978 = vperm.xlu1 %1087, %v1992_v35  }
 0x21f   :  { %988 = vperm.xlu1 %1087, %v1998_v2  }
 0x223   :  { %998 = vperm.xlu1 %1087, %v2004_v37  }
 0x226   :  { %v664_v41 = vpop.xlane.xlu0 %663 }
 0x227   :  { %v717_v22 = vmul.f32 0.0051020407, %v664_v41  ;;  %1090 = vset.pattern.permute.xlu1 %v1122_v21 }
 0x229   :  { %v731_v44 = vadd.f32 0.001, %v717_v22 }
 0x22a   :  { %v668_v45 = vpop.xlane.xlu1 %667 }
 0x22b   :  { %1093 = vrsqrt.f32 %v731_v44  ;;  %v718_v12 = vmul.f32 0.0051020407, %v668_v45 }
 0x22d   :  { %v732_v50 = vadd.f32 0.001, %v718_v12 }
 0x22e   :  { %v672_v53 = vpop.xlane.xlu0 %671 }
 0x22f   :  { %1095 = vrsqrt.f32 %v732_v50  ;;  %v719_v30 = vmul.f32 0.0051020407, %v672_v53 }
 0x231   :  { %v733_v59 = vadd.f32 0.001, %v719_v30 }
 0x232   :  { %v676_v60 = vpop.xlane.xlu1 %675 }
 0x233   :  { %1097 = vrsqrt.f32 %v733_v59  ;;  %v720_v23 = vmul.f32 0.0051020407, %v676_v60 }
 0x235   :  { %v734_v1 = vadd.f32 0.001, %v720_v23 }
 0x236   :  { %v680_v3 = vpop.xlane.xlu0 %679 }
 0x237   :  { %1099 = vrsqrt.f32 %v734_v1  ;;  %v721_v38 = vmul.f32 0.0051020407, %v680_v3 }
 0x238   :  { %v1094_v5 = vpop.eup %1093 }
 0x239   :  { %v735_v7 = vadd.f32 0.001, %v721_v38  ;;  %v773_v17 = vmul.f32 %v1094_v5, %v759_v29 }
 0x23a   :  { %v684_v6 = vpop.xlane.xlu1 %683 }
 0x23b   :  { %1101 = vrsqrt.f32 %v735_v7  ;;  %v722_v21 = vmul.f32 0.0051020407, %v684_v6  ;;  %817 = vperm.xlu0 %1089, %v773_v17  }
 0x23c   :  { %v1096_v27 = vpop.eup %1095 }
 0x23d   :  { %v736_v28 = vadd.f32 0.001, %v722_v21  ;;  %v774_v14 = vmul.f32 %v1096_v27, %v760_v62 }
 0x23e   :  { %v688_v33 = vpop.xlane.xlu0 %687 }
 0x23f   :  { %1103 = vrsqrt.f32 %v736_v28  ;;  %v723_v41 = vmul.f32 0.0051020407, %v688_v33  ;;  %822 = vperm.xlu1 %1090, %v774_v14  }
 0x240   :  { %v1098_v22 = vpop.eup %1097 }
 0x241   :  { %v737_v44 = vadd.f32 0.001, %v723_v41  ;;  %v775_v45 = vmul.f32 %v1098_v22, %v1939_v34 }
 0x242   :  { %v692_v12 = vpop.xlane.xlu1 %691 }
 0x243   :  { %1105 = vrsqrt.f32 %v737_v44  ;;  %v724_v50 = vmul.f32 0.0051020407, %v692_v12  ;;  %827 = vperm.xlu1 %1090, %v775_v45  }
 0x244   :  { %v1100_v29 = vpop.eup %1099 }
 0x245   :  { %v738_v53 = vadd.f32 0.001, %v724_v50  ;;  %v776_v30 = vmul.f32 %v1100_v29, %v762_v43 }
 0x246   :  { %v696_v59 = vpop.xlane.xlu0 %695 }
 0x247   :  { %1107 = vrsqrt.f32 %v738_v53  ;;  %v725_v60 = vmul.f32 0.0051020407, %v696_v59  ;;  %832 = vperm.xlu1 %1090, %v776_v30   ;;  %v771_v59 = vld [vmem:[%s2268_s3 + $0x60] sm:$0xff] }
 0x248   :  { %v1102_v62 = vpop.eup %1101 }
 0x249   :  { %v739_v23 = vadd.f32 0.001, %v725_v60  ;;  %v777_v1 = vmul.f32 %v1102_v62, %v1948_v10 }
 0x24a   :  { %v700_v3 = vpop.xlane.xlu1 %699 }
 0x24b   :  { %1109 = vrsqrt.f32 %v739_v23  ;;  %v726_v38 = vmul.f32 0.0051020407, %v700_v3  ;;  %837 = vperm.xlu1 %1090, %v777_v1  }
 0x24c   :  { %v1104_v34 = vpop.eup %1103 }
 0x24d   :  { %v740_v5 = vadd.f32 0.001, %v726_v38  ;;  %v778_v7 = vmul.f32 %v1104_v34, %v1986_v39 }
 0x24e   :  { %v704_v17 = vpop.xlane.xlu0 %703 }
 0x24f   :  { %1111 = vrsqrt.f32 %v740_v5  ;;  %v727_v6 = vmul.f32 0.0051020407, %v704_v17  ;;  %842 = vperm.xlu1 %1090, %v778_v7  }
 0x250   :  { %v1106_v43 = vpop.eup %1105 }
 0x251   :  { %v741_v21 = vadd.f32 0.001, %v727_v6  ;;  %v779_v27 = vmul.f32 %v1106_v43, %v1954_v11 }
 0x252   :  { %v708_v28 = vpop.xlane.xlu1 %707 }
 0x253   :  { %1113 = vrsqrt.f32 %v741_v21  ;;  %v728_v14 = vmul.f32 0.0051020407, %v708_v28  ;;  %847 = vperm.xlu1 %1090, %v779_v27  }
 0x254   :  { %v1108_v10 = vpop.eup %1107 }
 0x255   :  { %v742_v33 = vadd.f32 0.001, %v728_v14  ;;  %v780_v41 = vmul.f32 %v1108_v10, %v1992_v35  ;;  %v787_v10 = vld [vmem:[%s2269_s2] sm:$0xff] }
 0x256   :  { %v712_v22 = vpop.xlane.xlu0 %711 }
 0x257   :  { %1115 = vrsqrt.f32 %v742_v33  ;;  %v729_v44 = vmul.f32 0.0051020407, %v712_v22  ;;  %852 = vperm.xlu1 %1090, %v780_v41  }
 0x258   :  { %v1110_v39 = vpop.eup %1109 }
 0x259   :  { %v743_v45 = vadd.f32 0.001, %v729_v44  ;;  %v781_v12 = vmul.f32 %v1110_v39, %v1960_v46 }
 0x25b   :  { %1117 = vrsqrt.f32 %v743_v45  ;;  %857 = vperm.xlu1 %1090, %v781_v12   ;;  %v789_v45 = vld [vmem:[%s2269_s2 + $0x10] sm:$0xff]  ;;  %v790_v12 = vld [vmem:[%s2269_s2 + $0x18] sm:$0xff] }
 0x25c   :  { %v1112_v50 = vpop.eup %1111 }
 0x25d   :  { %v782_v11 = vmul.f32 %v1112_v50, %v1998_v2  ;;  %v772_v2 = vld [vmem:[%s2268_s3 + $0x68] sm:$0xff] }
 0x25e   :  { %v949_v3 = vpop.permute.xlu0 %948 }
 0x25f   :  { %862 = vperm.xlu0 %1089, %v782_v11  }
 0x260   :  { %v1114_v29 = vpop.eup %1113 }
 0x261   :  { %v783_v53 = vmul.f32 %v1114_v29, %v1966_v18  ;;  %v944_v18 = vpop.permute.xlu1 %943 }
 0x262   :  { %v2023_v7 = vpop.permute.xlu0 %963 }
 0x263   :  { %867 = vperm.xlu1 %1090, %v783_v53  }
 0x264   :  { %v1116_v30 = vpop.eup %1115 }
 0x265   :  { %v784_v35 = vmul.f32 %v1116_v30, %v2004_v37  ;;  %v954_v62 = vpop.permute.xlu1 %953 }
 0x266   :  { %v2028_v6 = vpop.permute.xlu0 %973 }
 0x267   :  { %872 = vperm.xlu0 %1089, %v784_v35  }
 0x268   :  { %v1118_v60 = vpop.eup %1117 }
 0x269   :  { %v785_v46 = vmul.f32 %v1118_v60, %v771_v59 }
 0x26a   :  { %v2032_v21 = vpop.permute.xlu0 %983 }
 0x26b   :  { %877 = vperm.xlu1 %1090, %v785_v46  }
 0x26e   :  { %v2036_v28 = vpop.permute.xlu0 %993 }
 0x26f   :  { %1092 = vset.pattern.permute.xlu1 %v1121_v47 }
 0x270   :  { %1008 = vperm.xlu1 %1092, %v772_v2  }
 0x28b   :  { %v716_v23 = vpop.xlane.xlu1 %715 }
 0x28c   :  { %v730_v1 = vmul.f32 0.0051020407, %v716_v23 }
 0x28e   :  { %v744_v37 = vadd.f32 0.001, %v730_v1 }
 0x28f   :  { %v959_v34 = vpop.permute.xlu1 %958 }
 0x290   :  { %1119 = vrsqrt.f32 %v744_v37 }
 0x293   :  { %v2025_v17 = vpop.permute.xlu1 %968 }
 0x297   :  { %v2030_v43 = vpop.permute.xlu1 %978 }
 0x29b   :  { %v2034_v27 = vpop.permute.xlu1 %988 }
 0x29d   :  { %v1120_v38 = vpop.eup %1119 }
 0x29e   :  { %v786_v5 = vmul.f32 %v1120_v38, %v772_v2 }
 0x29f   :  { %v2038_v14 = vpop.permute.xlu1 %998 }
 0x2a0   :  { %882 = vperm.xlu0 %1089, %v786_v5  }
 0x2a4   :  { %1091 = vset.pattern.permute.xlu0 %v1121_v47  ;;  %v788_v47 = vld [vmem:[%s2269_s2 + $0x8] sm:$0xff] }
 0x2a5   :  { %1003 = vperm.xlu0 %1091, %v771_v59  }
 0x2b6   :  { %v818_v33 = vpop.permute.xlu0 %817 }
 0x2b7   :  { %v885_v41 = vmul.f32 %v818_v33, %v1791_v51  ;;  %v886_v22 = vmul.f32 %v818_v33, %v1794_v52 }
 0x2b9   :  { %v913_v44 = vadd.f32 %v885_v41, %v787_v10  ;;  %v914_v39 = vadd.f32 %v886_v22, %v788_v47 }
 0x2ba   :  { %v823_v50 = vpop.permute.xlu1 %822 }
 0x2bb   :  { %v1011_v11 = vadd.f32 %v944_v18, %v913_v44  ;;  %v1012_v29 = vadd.f32 %v944_v18, %v914_v39  ;;  %v887_v53 = vmul.f32 %v823_v50, %v1801_v61  ;;  %v888_v30 = vmul.f32 %v823_v50, %v1804_v63 }
 0x2bd   :  { %1039 = vst [vmem:[%s2270_s4] sm:$0xff] %v1011_v11  ;;  %1040 = vst.msk [vmem:[%s2270_s4 + $0x8] sm:$0xff] %vm534_vm1, %v1012_v29  ;;  %v915_v51 = vadd.f32 %v887_v53, %v789_v45  ;;  %v916_v52 = vadd.f32 %v888_v30, %v790_v12 }
 0x2be   :  { %v828_v63 = vpop.permute.xlu1 %827 }
 0x2bf   :  { %v1013_v59 = vadd.f32 %v949_v3, %v915_v51  ;;  %v1014_v60 = vadd.f32 %v949_v3, %v916_v52  ;;  %v889_v46 = vmul.f32 %v828_v63, %v1812_v9  ;;  %v890_v2 = vmul.f32 %v828_v63, %v1815_v0 }
 0x2c2   :  { %v833_v0 = vpop.permute.xlu1 %832 }
 0x2c3   :  { %v891_v38 = vmul.f32 %v833_v0, %v1823_v19  ;;  %v892_v5 = vmul.f32 %v833_v0, %v1826_v8 }
 0x2c4   :  { %v791_v35 = vld [vmem:[%s2269_s2 + $0x20] sm:$0xff]  ;;  %v792_v61 = vld [vmem:[%s2269_s2 + $0x28] sm:$0xff] }
 0x2c5   :  { %1041 = vst [vmem:[%s2270_s4 + $0x10] sm:$0xff] %v1013_v59  ;;  %1042 = vst.msk [vmem:[%s2270_s4 + $0x18] sm:$0xff] %vm534_vm1, %v1014_v60  ;;  %v917_v18 = vadd.f32 %v889_v46, %v791_v35  ;;  %v918_v23 = vadd.f32 %v890_v2, %v792_v61 }
 0x2c6   :  { %v838_v8 = vpop.permute.xlu1 %837 }
 0x2c7   :  { %v1015_v37 = vadd.f32 %v954_v62, %v917_v18  ;;  %v1016_v3 = vadd.f32 %v954_v62, %v918_v23  ;;  %v893_v22 = vmul.f32 %v838_v8, %v1834_v31  ;;  %v894_v44 = vmul.f32 %v838_v8, %v1837_v16 }
 0x2ca   :  { %v843_v16 = vpop.permute.xlu1 %842 }
 0x2cb   :  { %v895_v11 = vmul.f32 %v843_v16, %v1845_v42  ;;  %v896_v29 = vmul.f32 %v843_v16, %v1848_v24 }
 0x2cc   :  { %v793_v1 = vld [vmem:[%s2269_s2 + $0x30] sm:$0xff]  ;;  %v794_v9 = vld [vmem:[%s2269_s2 + $0x38] sm:$0xff] }
 0x2cd   :  { %1043 = vst [vmem:[%s2270_s4 + $0x20] sm:$0xff] %v1015_v37  ;;  %1044 = vst.msk [vmem:[%s2270_s4 + $0x28] sm:$0xff] %vm534_vm1, %v1016_v3  ;;  %v919_v10 = vadd.f32 %v891_v38, %v793_v1  ;;  %v920_v47 = vadd.f32 %v892_v5, %v794_v9 }
 0x2ce   :  { %v848_v24 = vpop.permute.xlu1 %847 }
 0x2cf   :  { %v1017_v62 = vadd.f32 %v959_v34, %v919_v10  ;;  %v1018_v41 = vadd.f32 %v959_v34, %v920_v47  ;;  %v897_v35 = vmul.f32 %v848_v24, %v1856_v57  ;;  %v898_v61 = vmul.f32 %v848_v24, %v1859_v32 }
 0x2d2   :  { %v853_v32 = vpop.permute.xlu1 %852 }
 0x2d3   :  { %v899_v2 = vmul.f32 %v853_v32, %v1867_v54  ;;  %v900_v18 = vmul.f32 %v853_v32, %v1870_v40 }
 0x2d4   :  { %v795_v33 = vld [vmem:[%s2269_s2 + $0x40] sm:$0xff]  ;;  %v796_v19 = vld [vmem:[%s2269_s2 + $0x48] sm:$0xff] }
 0x2d5   :  { %1045 = vst [vmem:[%s2270_s4 + $0x30] sm:$0xff] %v1017_v62  ;;  %1046 = vst.msk [vmem:[%s2270_s4 + $0x38] sm:$0xff] %vm534_vm1, %v1018_v41  ;;  %v921_v39 = vadd.f32 %v893_v22, %v795_v33  ;;  %v922_v45 = vadd.f32 %v894_v44, %v796_v19 }
 0x2d6   :  { %v858_v40 = vpop.permute.xlu1 %857 }
 0x2d7   :  { %v1019_v34 = vadd.f32 %v2023_v7, %v921_v39  ;;  %v1020_v50 = vadd.f32 %v2023_v7, %v922_v45  ;;  %v901_v37 = vmul.f32 %v858_v40, %v1878_v13  ;;  %v902_v3 = vmul.f32 %v858_v40, %v1881_v48 }
 0x2da   :  { %v863_v48 = vpop.permute.xlu0 %862 }
 0x2db   :  { %v903_v33 = vmul.f32 %v863_v48, %v1889_v26  ;;  %v904_v19 = vmul.f32 %v863_v48, %v1892_v58 }
 0x2dc   :  { %v797_v12 = vld [vmem:[%s2269_s2 + $0x50] sm:$0xff]  ;;  %v798_v31 = vld [vmem:[%s2269_s2 + $0x58] sm:$0xff] }
 0x2dd   :  { %1047 = vst [vmem:[%s2270_s4 + $0x40] sm:$0xff] %v1019_v34  ;;  %1048 = vst.msk [vmem:[%s2270_s4 + $0x48] sm:$0xff] %vm534_vm1, %v1020_v50  ;;  %v923_v53 = vadd.f32 %v895_v11, %v797_v12  ;;  %v924_v30 = vadd.f32 %v896_v29, %v798_v31 }
 0x2de   :  { %v868_v58 = vpop.permute.xlu1 %867 }
 0x2df   :  { %v1021_v7 = vadd.f32 %v2025_v17, %v923_v53  ;;  %v1022_v52 = vadd.f32 %v2025_v17, %v924_v30  ;;  %v905_v44 = vmul.f32 %v868_v58, %v1900_v36  ;;  %v906_v39 = vmul.f32 %v868_v58, %v1903_v4 }
 0x2e2   :  { %v873_v4 = vpop.permute.xlu0 %872 }
 0x2e3   :  { %v907_v34 = vmul.f32 %v873_v4, %v1911_v49  ;;  %v908_v50 = vmul.f32 %v873_v4, %v1914_v15 }
 0x2e4   :  { %v799_v51 = vld [vmem:[%s2269_s2 + $0x60] sm:$0xff]  ;;  %v800_v42 = vld [vmem:[%s2269_s2 + $0x68] sm:$0xff] }
 0x2e5   :  { %1049 = vst [vmem:[%s2270_s4 + $0x50] sm:$0xff] %v1021_v7  ;;  %1050 = vst.msk [vmem:[%s2270_s4 + $0x58] sm:$0xff] %vm534_vm1, %v1022_v52  ;;  %v925_v63 = vadd.f32 %v897_v35, %v799_v51  ;;  %v926_v59 = vadd.f32 %v898_v61, %v800_v42 }
 0x2e6   :  { %v878_v49 = vpop.permute.xlu1 %877 }
 0x2e7   :  { %v1023_v17 = vadd.f32 %v2028_v6, %v925_v63  ;;  %v1024_v46 = vadd.f32 %v2028_v6, %v926_v59  ;;  %v909_v15 = vmul.f32 %v878_v49, %v1922_v56 }
 0x2ec   :  { %v801_v60 = vld [vmem:[%s2269_s2 + $0x70] sm:$0xff]  ;;  %v802_v57 = vld [vmem:[%s2269_s2 + $0x78] sm:$0xff] }
 0x2ed   :  { %1051 = vst [vmem:[%s2270_s4 + $0x60] sm:$0xff] %v1023_v17  ;;  %1052 = vst.msk [vmem:[%s2270_s4 + $0x68] sm:$0xff] %vm534_vm1, %v1024_v46  ;;  %v927_v23 = vadd.f32 %v899_v2, %v801_v60  ;;  %v928_v1 = vadd.f32 %v900_v18, %v802_v57 }
 0x2ef   :  { %v1025_v6 = vadd.f32 %v2030_v43, %v927_v23  ;;  %v1026_v0 = vadd.f32 %v2030_v43, %v928_v1 }
 0x2f4   :  { %v803_v9 = vld [vmem:[%s2269_s2 + $0x80] sm:$0xff]  ;;  %v804_v54 = vld [vmem:[%s2269_s2 + $0x88] sm:$0xff] }
 0x2f5   :  { %1053 = vst [vmem:[%s2270_s4 + $0x70] sm:$0xff] %v1025_v6  ;;  %1054 = vst.msk [vmem:[%s2270_s4 + $0x78] sm:$0xff] %vm534_vm1, %v1026_v0  ;;  %v929_v38 = vadd.f32 %v901_v37, %v803_v9  ;;  %v930_v5 = vadd.f32 %v902_v3, %v804_v54 }
 0x2f7   :  { %v1027_v43 = vadd.f32 %v2032_v21, %v929_v38  ;;  %v1028_v47 = vadd.f32 %v2032_v21, %v930_v5 }
 0x2fc   :  { %v805_v10 = vld [vmem:[%s2269_s2 + $0x90] sm:$0xff]  ;;  %v806_v13 = vld [vmem:[%s2269_s2 + $0x98] sm:$0xff] }
 0x2fd   :  { %1055 = vst [vmem:[%s2270_s4 + $0x80] sm:$0xff] %v1027_v43  ;;  %1056 = vst.msk [vmem:[%s2270_s4 + $0x88] sm:$0xff] %vm534_vm1, %v1028_v47  ;;  %v931_v8 = vadd.f32 %v903_v33, %v805_v10  ;;  %v932_v62 = vadd.f32 %v904_v19, %v806_v13 }
 0x2ff   :  { %v1029_v21 = vadd.f32 %v2034_v27, %v931_v8  ;;  %v1030_v22 = vadd.f32 %v2034_v27, %v932_v62 }
 0x304   :  { %v807_v41 = vld [vmem:[%s2269_s2 + $0xa0] sm:$0xff]  ;;  %v808_v26 = vld [vmem:[%s2269_s2 + $0xa8] sm:$0xff] }
 0x305   :  { %1057 = vst [vmem:[%s2270_s4 + $0x90] sm:$0xff] %v1029_v21  ;;  %1058 = vst.msk [vmem:[%s2270_s4 + $0x98] sm:$0xff] %vm534_vm1, %v1030_v22  ;;  %v933_v45 = vadd.f32 %v905_v44, %v807_v41  ;;  %v934_v12 = vadd.f32 %v906_v39, %v808_v26 }
 0x307   :  { %v1031_v27 = vadd.f32 %v2036_v28, %v933_v45  ;;  %v1032_v16 = vadd.f32 %v2036_v28, %v934_v12  ;;  %v910_v28 = vmul.f32 %v878_v49, %v1925_v25  ;;  %v1009_v25 = vpop.permute.xlu1 %1008 }
 0x30c   :  { %v809_v31 = vld [vmem:[%s2269_s2 + $0xb0] sm:$0xff]  ;;  %v810_v36 = vld [vmem:[%s2269_s2 + $0xb8] sm:$0xff] }
 0x30d   :  { %1059 = vst [vmem:[%s2270_s4 + $0xa0] sm:$0xff] %v1031_v27  ;;  %1060 = vst.msk [vmem:[%s2270_s4 + $0xa8] sm:$0xff] %vm534_vm1, %v1032_v16  ;;  %v935_v11 = vadd.f32 %v907_v34, %v809_v31  ;;  %v936_v29 = vadd.f32 %v908_v50, %v810_v36 }
 0x30f   :  { %v1033_v53 = vadd.f32 %v2038_v14, %v935_v11  ;;  %v1034_v30 = vadd.f32 %v2038_v14, %v936_v29 }
 0x311   :  { %1061 = vst [vmem:[%s2270_s4 + $0xb0] sm:$0xff] %v1033_v53  ;;  %1062 = vst.msk [vmem:[%s2270_s4 + $0xb8] sm:$0xff] %vm534_vm1, %v1034_v30 }
 0x318   :  { %v813_v42 = vld [vmem:[%s2269_s2 + $0xd0] sm:$0xff]  ;;  %v814_v14 = vld [vmem:[%s2269_s2 + $0xd8] sm:$0xff]  ;;  %v811_v52 = vld [vmem:[%s2269_s2 + $0xc0] sm:$0xff] }
 0x319   :  { %v812_v56 = vld [vmem:[%s2269_s2 + $0xc8] sm:$0xff]  ;;  %v937_v63 = vadd.f32 %v909_v15, %v811_v52 }
 0x31a   :  { %v938_v59 = vadd.f32 %v910_v28, %v812_v56 }
 0x31b   :  { %v883_v51 = vpop.permute.xlu0 %882 }
 0x31c   :  { %v911_v24 = vmul.f32 %v883_v51, %v1973_v55  ;;  %v912_v7 = vmul.f32 %v883_v51, %v1970_v20 }
 0x31e   :  { %v939_v35 = vadd.f32 %v911_v24, %v813_v42  ;;  %v940_v61 = vadd.f32 %v912_v7, %v814_v14 }
 0x320   :  { %v1037_v60 = vadd.f32 %v1009_v25, %v939_v35  ;;  %v1038_v57 = vadd.f32 %v1009_v25, %v940_v61  ;;  %v1004_v32 = vpop.permute.xlu0 %1003 }
 0x321   :  { %v1035_v17 = vadd.f32 %v1004_v32, %v937_v63  ;;  %v1036_v55 = vadd.f32 %v1004_v32, %v938_v59 }
 0x322   :  { %1065 = vst [vmem:[%s2270_s4 + $0xd0] sm:$0xff] %v1037_v60  ;;  %1066 = vst.msk [vmem:[%s2270_s4 + $0xd8] sm:$0xff] %vm534_vm1, %v1038_v57 }
 0x323   :  { %1063 = vst [vmem:[%s2270_s4 + $0xc0] sm:$0xff] %v1035_v17  ;;  %1064 = vst.msk [vmem:[%s2270_s4 + $0xc8] sm:$0xff] %vm534_vm1, %v1036_v55 }

</bundles_post_ra>
